<compile_context>
chip_gen: v5e
topology: v5e:2x2
jax: 0.10.0
libtpu: 0.0.40
codegen_flags: <defaults>
</compile_context>

<pallas_src>
import jax
import jax.numpy as jnp
from jax.experimental import pallas as pl
from jax.experimental.pallas import tpu as pltpu

_PAD = 3          # largest halo needed (k=3, dilation=3 -> padding=3)
_BN_EPS = 1e-5


def _gelu_tanh(x):
    # TODO(synk): PyTorch nn.GELU() default is exact erf-GELU; lax.erf has no
    # Mosaic lowering, so the tanh approximation is used inside the kernel
    # (max abs deviation ~1e-3, accounted for in the test tolerance).
    return jax.nn.gelu(x, approximate=True)


def _enhance_kernel(x_ref, w_ref, sb_ref, o_ref, buf_ref):
    """Fused Conv1x1 -> Conv3(p=1) -> Conv3(p=3,d=3), each + BN + GELU.

    x_ref  : (TB, L, C) bf16   channels-last activation block
    w_ref  : (7, C, C)  bf16   taps: [0]=1x1, [1:4]=k3/d1, [4:7]=k3/d3 (Cin,Cout)
    sb_ref : (6, C)     f32    folded BN scale/shift pairs per stage
    o_ref  : (TB, L, C) f32
    buf_ref: (TB, L+6, C) f32  scratch with per-batch halo rows
    """
    TB, L, C = x_ref.shape
    M = TB * L

    def epilogue(acc, row):
        s = sb_ref[row:row + 1, :]          # (1, C) f32
        b = sb_ref[row + 1:row + 2, :]
        return _gelu_tanh(acc * s + b)

    # ---- stage 1: 1x1 conv == one (M, C) x (C, C) bf16 matmul -------------
    x = x_ref[...].reshape(M, C)                                   # bf16
    y = jnp.dot(x, w_ref[0], preferred_element_type=jnp.float32)   # f32 acc
    y = epilogue(y, 0)

    # ---- zero only halo rows, once.  Both k=3 stages write their activation
    # ---- at offset _PAD, so the halos are never overwritten and stay valid.
    halo = jnp.zeros((TB, _PAD, C), dtype=buf_ref.dtype)
    buf_ref[:, 0:_PAD, :] = halo
    buf_ref[:, _PAD + L:2 * _PAD + L, :] = halo

    def conv3_bn_gelu(y_in, w_base, dil, sb_row):
        buf_ref[:, _PAD:_PAD + L, :] = y_in.reshape(TB, L, C)      # f32 stage act
        acc = None
        for k in range(3):                    # taps at row offsets -dil, 0, +dil
            start = _PAD + (k - 1) * dil
            tap = buf_ref[:, start:start + L, :].reshape(M, C).astype(jnp.bfloat16)
            part = jnp.dot(tap, w_ref[w_base + k],
                           preferred_element_type=jnp.float32)
            acc = part if acc is None else acc + part
        return epilogue(acc, sb_row)

    y = conv3_bn_gelu(y, 1, 1, 2)   # k=3, padding=1, dilation=1
    y = conv3_bn_gelu(y, 4, 3, 4)   # k=3, padding=3, dilation=3

    o_ref[...] = y.reshape(TB, L, C).astype(o_ref.dtype)


def _pick_batch_tile(B, L):
    """Largest divisor of B keeping the per-step matmul M = TB*L around <=512
    rows; if that collapses the grid to one step, split once so v7x's two
    TensorCores both get work (only when each half still has M >= 128)."""
    tb = 1
    for d in range(1, B + 1):
        if B % d == 0 and d * L <= max(L, 512):
            tb = d
    if B // tb < 2 and B % 2 == 0 and (B // 2) * L >= 128:
        tb = B // 2
    return tb


def enhance_forward(x_ncl, params):
    """Enhance forward pass.  x_ncl: (B, C, L) as in PyTorch Conv1d input."""
    B, C, L = x_ncl.shape
    x = jnp.transpose(x_ncl, (0, 2, 1)).astype(jnp.bfloat16)       # (B, L, C)

    TB = _pick_batch_tile(B, L)
    # TODO(synk): for very long sequences also tile L (extra grid axis with a
    # 4-row cumulative halo per side) instead of whole-sequence blocks.

    cost = pl.CostEstimate(
        flops=2 * 7 * B * L * C * C,
        transcendentals=3 * B * L * C,
        bytes_accessed=B * L * C * (2 + 4) + 7 * C * C * 2 + 6 * C * 4,
    )

    out = pl.pallas_call(
        _enhance_kernel,
        out_shape=jax.ShapeDtypeStruct((B, L, C), x_ncl.dtype),
        grid=(B // TB,),
        in_specs=[
            pl.BlockSpec((TB, L, C), lambda i: (i, 0, 0)),
            pl.BlockSpec((7, C, C), lambda i: (0, 0, 0)),
            pl.BlockSpec((6, C), lambda i: (0, 0)),
        ],
        out_specs=pl.BlockSpec((TB, L, C), lambda i: (i, 0, 0)),
        scratch_shapes=[pltpu.VMEM((TB, L + 2 * _PAD, C), jnp.float32)],
        compiler_params=pltpu.CompilerParams(
            dimension_semantics=("parallel",),
            vmem_limit_bytes=32 * 1024 * 1024),
        cost_estimate=cost,
    )(x, params["w"], params["sb"])
    return jnp.transpose(out, (0, 2, 1))                           # back to (B, C, L)


# ----------------------------------------------------------------------------
# Parameter construction (raw torch-like params + inference-mode BN folding)
# ----------------------------------------------------------------------------
def init_raw_params(key, C):
    keys = iter(jax.random.split(key, 32))

    def nrm(shape, s=0.1):
        return jax.random.normal(next(keys), shape, jnp.float32) * s

    def layer(k):
        return dict(
            w=nrm((k, C, C)),                 # (K, Cin, Cout)
            b=nrm((C,)),                      # conv bias
            gamma=1.0 + nrm((C,)),            # BN weight
            beta=nrm((C,)),                   # BN bias
            mean=nrm((C,)),                   # BN running_mean
            var=1.0 + jnp.abs(nrm((C,))),     # BN running_var (> 0)
        )

    return [layer(1), layer(3), layer(3)]


def fold_params(raw):
    """Fold conv bias + BN running stats into per-channel scale/shift and pack
    all conv taps into a single bf16 (7, C, C) slab."""
    w = jnp.concatenate([p["w"] for p in raw], axis=0).astype(jnp.bfloat16)
    rows = []
    for p in raw:
        scale = p["gamma"] / jnp.sqrt(p["var"] + _BN_EPS)
        shift = (p["b"] - p["mean"]) * scale + p["beta"]
        rows += [scale, shift]
    sb = jnp.stack(rows, axis=0).astype(jnp.float32)               # (6, C)
    return dict(w=w, sb=sb)


# ----------------------------------------------------------------------------
# Pure-JAX f32 reference (mirrors the PyTorch module in eval mode, exact GELU)
# ----------------------------------------------------------------------------
def _conv1d_ref(x_blc, w_kio, bias, pad, dil):
    _, L, _ = x_blc.shape
    K = w_kio.shape[0]
    xp = jnp.pad(x_blc, ((0, 0), (pad, pad), (0, 0)))
    y = jnp.zeros((x_blc.shape[0], L, w_kio.shape[2]), jnp.float32)
    for k in range(K):
        y = y + jnp.einsum("blc,cd->bld",
                           xp[:, k * dil:k * dil + L, :], w_kio[k])
    return y + bias


def enhance_reference(x_ncl, raw):
    x = jnp.transpose(x_ncl, (0, 2, 1))
    cfgs = ((1, 0, 1), (3, 1, 1), (3, 3, 3))                 # (K, pad, dil)
    for p, (_, pad, dil) in zip(raw, cfgs):
        y = _conv1d_ref(x, p["w"], p["b"], pad, dil)
        y = (y - p["mean"]) / jnp.sqrt(p["var"] + _BN_EPS) * p["gamma"] + p["beta"]
        x = jax.nn.gelu(y, approximate=False)                # exact erf-GELU; Dropout = id (eval)
    return jnp.transpose(x, (0, 2, 1))


# ----------------------------------------------------------------------------
if __name__ == "__main__":
    B, C, L = 2, 32, 16          # batch, g (channels), sequence length

    key = jax.random.PRNGKey(0)
    kp, kx = jax.random.split(key)
    raw = init_raw_params(kp, C)
    params = fold_params(raw)
    x_in = jax.random.normal(kx, (B, C, L), jnp.float32)     # PyTorch NCL layout

    out = jax.jit(enhance_forward)(x_in, params)
    out = jax.block_until_ready(out)

    assert out.shape == (B, C, L)
    assert bool(jnp.all(jnp.isfinite(out)))

    ref = enhance_reference(x_in, raw)
    err = float(jnp.max(jnp.abs(out - ref)))
    # Error budget: bf16 MXU operands across three chained matmul stages plus
    # the tanh-GELU approximation (exact erf-GELU has no Mosaic lowering).
    assert err < 2.5e-2, f"max abs diff vs reference: {err}"

    print("KERNEL_OK")
</pallas_src>

<mosaic_0001>
module attributes {stable_mosaic.version = 11 : i64} {
  func.func @_enhance_kernel(%arg0: i32, %arg1: memref<2x16x32xbf16, #tpu.memory_space<vmem>>, %arg2: memref<7x32x32xbf16, #tpu.memory_space<vmem>>, %arg3: memref<6x32xf32, #tpu.memory_space<vmem>>, %arg4: memref<2x16x32xf32, #tpu.memory_space<vmem>>, %arg5: memref<2x22x32xf32, #tpu.memory_space<vmem>>) attributes {dimension_semantics = [#tpu.dimension_semantics<parallel>], iteration_bounds = array<i64: 1>, scalar_prefetch = 0 : i64, scratch_operands = 1 : i64, tpu.core_type = #tpu.core_type<tc>, window_params = [{transform_indices = @transform_0, window_bounds = array<i64: 2, 16, 32>}, {pipeline_mode = #tpu.pipeline_mode<synchronous>, transform_indices = @transform_1, window_bounds = array<i64: 7, 32, 32>}, {pipeline_mode = #tpu.pipeline_mode<synchronous>, transform_indices = @transform_2, window_bounds = array<i64: 6, 32>}, {transform_indices = @transform_3, window_bounds = array<i64: 2, 16, 32>}]} {
    %c0 = arith.constant 0 : index
    %c0_0 = arith.constant 0 : index
    %c0_1 = arith.constant 0 : index
    %0 = vector.load %arg1[%c0, %c0_0, %c0_1] : memref<2x16x32xbf16, #tpu.memory_space<vmem>>, vector<2x16x32xbf16>
    %1 = vector.shape_cast %0 : vector<2x16x32xbf16> to vector<32x32xbf16>
    %c0_2 = arith.constant 0 : index
    %c0_3 = arith.constant 0 : index
    %c0_4 = arith.constant 0 : index
    %2 = vector.load %arg2[%c0_2, %c0_3, %c0_4] : memref<7x32x32xbf16, #tpu.memory_space<vmem>>, vector<1x32x32xbf16>
    %3 = vector.shape_cast %2 : vector<1x32x32xbf16> to vector<32x32xbf16>
    %cst = arith.constant dense<0.000000e+00> : vector<32x32xf32>
    %4 = tpu.matmul %1, %3, %cst {dimension_numbers = #tpu.dot_dimension_numbers<[1], [0], [0], [1], [0, 0, 1, 1], [], []>} : vector<32x32xbf16>, vector<32x32xbf16>, vector<32x32xf32> -> vector<32x32xf32>
    %c0_5 = arith.constant 0 : index
    %c0_6 = arith.constant 0 : index
    %5 = vector.load %arg3[%c0_5, %c0_6] : memref<6x32xf32, #tpu.memory_space<vmem>>, vector<1x32xf32>
    %c1 = arith.constant 1 : index
    %c0_7 = arith.constant 0 : index
    %6 = vector.load %arg3[%c1, %c0_7] : memref<6x32xf32, #tpu.memory_space<vmem>>, vector<1x32xf32>
    %7 = vector.broadcast %5 : vector<1x32xf32> to vector<32x32xf32>
    %8 = arith.mulf %4, %7 : vector<32x32xf32>
    %9 = vector.broadcast %6 : vector<1x32xf32> to vector<32x32xf32>
    %10 = arith.addf %8, %9 : vector<32x32xf32>
    %11 = arith.mulf %10, %10 : vector<32x32xf32>
    %12 = arith.mulf %10, %11 : vector<32x32xf32>
    %cst_8 = arith.constant 4.471500e-02 : f32
    %13 = vector.broadcast %cst_8 : f32 to vector<32x32xf32>
    %14 = arith.mulf %13, %12 : vector<32x32xf32>
    %15 = arith.addf %10, %14 : vector<32x32xf32>
    %cst_9 = arith.constant 0.797884583 : f32
    %16 = vector.broadcast %cst_9 : f32 to vector<32x32xf32>
    %17 = arith.mulf %16, %15 : vector<32x32xf32>
    %18 = math.tanh %17 : vector<32x32xf32>
    %cst_10 = arith.constant 1.000000e+00 : f32
    %19 = vector.broadcast %cst_10 : f32 to vector<32x32xf32>
    %20 = arith.addf %19, %18 : vector<32x32xf32>
    %cst_11 = arith.constant 5.000000e-01 : f32
    %21 = vector.broadcast %cst_11 : f32 to vector<32x32xf32>
    %22 = arith.mulf %21, %20 : vector<32x32xf32>
    %23 = arith.mulf %10, %22 : vector<32x32xf32>
    %cst_12 = arith.constant 0.000000e+00 : f32
    %24 = vector.broadcast %cst_12 : f32 to vector<2x3x32xf32>
    %c0_13 = arith.constant 0 : index
    %c0_14 = arith.constant 0 : index
    %c0_15 = arith.constant 0 : index
    %25 = vector.load %arg5[%c0_13, %c0_14, %c0_15] : memref<2x22x32xf32, #tpu.memory_space<vmem>>, vector<2x3x32xf32>
    tpu.vector_store %arg5[%c0_13, %c0_14, %c0_15], %24 {strides = array<i32>} : memref<2x22x32xf32, #tpu.memory_space<vmem>>, vector<2x3x32xf32>,
    %c0_16 = arith.constant 0 : index
    %c19 = arith.constant 19 : index
    %c0_17 = arith.constant 0 : index
    %26 = vector.load %arg5[%c0_16, %c19, %c0_17] : memref<2x22x32xf32, #tpu.memory_space<vmem>>, vector<2x3x32xf32>
    tpu.vector_store %arg5[%c0_16, %c19, %c0_17], %24 {strides = array<i32>} : memref<2x22x32xf32, #tpu.memory_space<vmem>>, vector<2x3x32xf32>,
    %27 = vector.shape_cast %23 : vector<32x32xf32> to vector<2x16x32xf32>
    %c0_18 = arith.constant 0 : index
    %c3 = arith.constant 3 : index
    %c0_19 = arith.constant 0 : index
    %28 = vector.load %arg5[%c0_18, %c3, %c0_19] : memref<2x22x32xf32, #tpu.memory_space<vmem>>, vector<2x16x32xf32>
    tpu.vector_store %arg5[%c0_18, %c3, %c0_19], %27 {strides = array<i32>} : memref<2x22x32xf32, #tpu.memory_space<vmem>>, vector<2x16x32xf32>,
    %c0_20 = arith.constant 0 : index
    %c2 = arith.constant 2 : index
    %c0_21 = arith.constant 0 : index
    %29 = vector.load %arg5[%c0_20, %c2, %c0_21] : memref<2x22x32xf32, #tpu.memory_space<vmem>>, vector<2x16x32xf32>
    %30 = vector.shape_cast %29 : vector<2x16x32xf32> to vector<32x32xf32>
    %31 = arith.truncf %30 : vector<32x32xf32> to vector<32x32xbf16>
    %c1_22 = arith.constant 1 : index
    %c0_23 = arith.constant 0 : index
    %c0_24 = arith.constant 0 : index
    %32 = vector.load %arg2[%c1_22, %c0_23, %c0_24] : memref<7x32x32xbf16, #tpu.memory_space<vmem>>, vector<1x32x32xbf16>
    %33 = vector.shape_cast %32 : vector<1x32x32xbf16> to vector<32x32xbf16>
    %cst_25 = arith.constant dense<0.000000e+00> : vector<32x32xf32>
    %34 = tpu.matmul %31, %33, %cst_25 {dimension_numbers = #tpu.dot_dimension_numbers<[1], [0], [0], [1], [0, 0, 1, 1], [], []>} : vector<32x32xbf16>, vector<32x32xbf16>, vector<32x32xf32> -> vector<32x32xf32>
    %c0_26 = arith.constant 0 : index
    %c3_27 = arith.constant 3 : index
    %c0_28 = arith.constant 0 : index
    %35 = vector.load %arg5[%c0_26, %c3_27, %c0_28] : memref<2x22x32xf32, #tpu.memory_space<vmem>>, vector<2x16x32xf32>
    %36 = vector.shape_cast %35 : vector<2x16x32xf32> to vector<32x32xf32>
    %37 = arith.truncf %36 : vector<32x32xf32> to vector<32x32xbf16>
    %c2_29 = arith.constant 2 : index
    %c0_30 = arith.constant 0 : index
    %c0_31 = arith.constant 0 : index
    %38 = vector.load %arg2[%c2_29, %c0_30, %c0_31] : memref<7x32x32xbf16, #tpu.memory_space<vmem>>, vector<1x32x32xbf16>
    %39 = vector.shape_cast %38 : vector<1x32x32xbf16> to vector<32x32xbf16>
    %cst_32 = arith.constant dense<0.000000e+00> : vector<32x32xf32>
    %40 = tpu.matmul %37, %39, %cst_32 {dimension_numbers = #tpu.dot_dimension_numbers<[1], [0], [0], [1], [0, 0, 1, 1], [], []>} : vector<32x32xbf16>, vector<32x32xbf16>, vector<32x32xf32> -> vector<32x32xf32>
    %41 = arith.addf %34, %40 : vector<32x32xf32>
    %c0_33 = arith.constant 0 : index
    %c4 = arith.constant 4 : index
    %c0_34 = arith.constant 0 : index
    %42 = vector.load %arg5[%c0_33, %c4, %c0_34] : memref<2x22x32xf32, #tpu.memory_space<vmem>>, vector<2x16x32xf32>
    %43 = vector.shape_cast %42 : vector<2x16x32xf32> to vector<32x32xf32>
    %44 = arith.truncf %43 : vector<32x32xf32> to vector<32x32xbf16>
    %c3_35 = arith.constant 3 : index
    %c0_36 = arith.constant 0 : index
    %c0_37 = arith.constant 0 : index
    %45 = vector.load %arg2[%c3_35, %c0_36, %c0_37] : memref<7x32x32xbf16, #tpu.memory_space<vmem>>, vector<1x32x32xbf16>
    %46 = vector.shape_cast %45 : vector<1x32x32xbf16> to vector<32x32xbf16>
    %cst_38 = arith.constant dense<0.000000e+00> : vector<32x32xf32>
    %47 = tpu.matmul %44, %46, %cst_38 {dimension_numbers = #tpu.dot_dimension_numbers<[1], [0], [0], [1], [0, 0, 1, 1], [], []>} : vector<32x32xbf16>, vector<32x32xbf16>, vector<32x32xf32> -> vector<32x32xf32>
    %48 = arith.addf %41, %47 : vector<32x32xf32>
    %c2_39 = arith.constant 2 : index
    %c0_40 = arith.constant 0 : index
    %49 = vector.load %arg3[%c2_39, %c0_40] : memref<6x32xf32, #tpu.memory_space<vmem>>, vector<1x32xf32>
    %c3_41 = arith.constant 3 : index
    %c0_42 = arith.constant 0 : index
    %50 = vector.load %arg3[%c3_41, %c0_42] : memref<6x32xf32, #tpu.memory_space<vmem>>, vector<1x32xf32>
    %51 = vector.broadcast %49 : vector<1x32xf32> to vector<32x32xf32>
    %52 = arith.mulf %48, %51 : vector<32x32xf32>
    %53 = vector.broadcast %50 : vector<1x32xf32> to vector<32x32xf32>
    %54 = arith.addf %52, %53 : vector<32x32xf32>
    %55 = arith.mulf %54, %54 : vector<32x32xf32>
    %56 = arith.mulf %54, %55 : vector<32x32xf32>
    %cst_43 = arith.constant 4.471500e-02 : f32
    %57 = vector.broadcast %cst_43 : f32 to vector<32x32xf32>
    %58 = arith.mulf %57, %56 : vector<32x32xf32>
    %59 = arith.addf %54, %58 : vector<32x32xf32>
    %cst_44 = arith.constant 0.797884583 : f32
    %60 = vector.broadcast %cst_44 : f32 to vector<32x32xf32>
    %61 = arith.mulf %60, %59 : vector<32x32xf32>
    %62 = math.tanh %61 : vector<32x32xf32>
    %cst_45 = arith.constant 1.000000e+00 : f32
    %63 = vector.broadcast %cst_45 : f32 to vector<32x32xf32>
    %64 = arith.addf %63, %62 : vector<32x32xf32>
    %cst_46 = arith.constant 5.000000e-01 : f32
    %65 = vector.broadcast %cst_46 : f32 to vector<32x32xf32>
    %66 = arith.mulf %65, %64 : vector<32x32xf32>
    %67 = arith.mulf %54, %66 : vector<32x32xf32>
    %68 = vector.shape_cast %67 : vector<32x32xf32> to vector<2x16x32xf32>
    %c0_47 = arith.constant 0 : index
    %c3_48 = arith.constant 3 : index
    %c0_49 = arith.constant 0 : index
    %69 = vector.load %arg5[%c0_47, %c3_48, %c0_49] : memref<2x22x32xf32, #tpu.memory_space<vmem>>, vector<2x16x32xf32>
    tpu.vector_store %arg5[%c0_47, %c3_48, %c0_49], %68 {strides = array<i32>} : memref<2x22x32xf32, #tpu.memory_space<vmem>>, vector<2x16x32xf32>,
    %c0_50 = arith.constant 0 : index
    %c0_51 = arith.constant 0 : index
    %c0_52 = arith.constant 0 : index
    %70 = vector.load %arg5[%c0_50, %c0_51, %c0_52] : memref<2x22x32xf32, #tpu.memory_space<vmem>>, vector<2x16x32xf32>
    %71 = vector.shape_cast %70 : vector<2x16x32xf32> to vector<32x32xf32>
    %72 = arith.truncf %71 : vector<32x32xf32> to vector<32x32xbf16>
    %c4_53 = arith.constant 4 : index
    %c0_54 = arith.constant 0 : index
    %c0_55 = arith.constant 0 : index
    %73 = vector.load %arg2[%c4_53, %c0_54, %c0_55] : memref<7x32x32xbf16, #tpu.memory_space<vmem>>, vector<1x32x32xbf16>
    %74 = vector.shape_cast %73 : vector<1x32x32xbf16> to vector<32x32xbf16>
    %cst_56 = arith.constant dense<0.000000e+00> : vector<32x32xf32>
    %75 = tpu.matmul %72, %74, %cst_56 {dimension_numbers = #tpu.dot_dimension_numbers<[1], [0], [0], [1], [0, 0, 1, 1], [], []>} : vector<32x32xbf16>, vector<32x32xbf16>, vector<32x32xf32> -> vector<32x32xf32>
    %c0_57 = arith.constant 0 : index
    %c3_58 = arith.constant 3 : index
    %c0_59 = arith.constant 0 : index
    %76 = vector.load %arg5[%c0_57, %c3_58, %c0_59] : memref<2x22x32xf32, #tpu.memory_space<vmem>>, vector<2x16x32xf32>
    %77 = vector.shape_cast %76 : vector<2x16x32xf32> to vector<32x32xf32>
    %78 = arith.truncf %77 : vector<32x32xf32> to vector<32x32xbf16>
    %c5 = arith.constant 5 : index
    %c0_60 = arith.constant 0 : index
    %c0_61 = arith.constant 0 : index
    %79 = vector.load %arg2[%c5, %c0_60, %c0_61] : memref<7x32x32xbf16, #tpu.memory_space<vmem>>, vector<1x32x32xbf16>
    %80 = vector.shape_cast %79 : vector<1x32x32xbf16> to vector<32x32xbf16>
    %cst_62 = arith.constant dense<0.000000e+00> : vector<32x32xf32>
    %81 = tpu.matmul %78, %80, %cst_62 {dimension_numbers = #tpu.dot_dimension_numbers<[1], [0], [0], [1], [0, 0, 1, 1], [], []>} : vector<32x32xbf16>, vector<32x32xbf16>, vector<32x32xf32> -> vector<32x32xf32>
    %82 = arith.addf %75, %81 : vector<32x32xf32>
    %c0_63 = arith.constant 0 : index
    %c6 = arith.constant 6 : index
    %c0_64 = arith.constant 0 : index
    %83 = vector.load %arg5[%c0_63, %c6, %c0_64] : memref<2x22x32xf32, #tpu.memory_space<vmem>>, vector<2x16x32xf32>
    %84 = vector.shape_cast %83 : vector<2x16x32xf32> to vector<32x32xf32>
    %85 = arith.truncf %84 : vector<32x32xf32> to vector<32x32xbf16>
    %c6_65 = arith.constant 6 : index
    %c0_66 = arith.constant 0 : index
    %c0_67 = arith.constant 0 : index
    %86 = vector.load %arg2[%c6_65, %c0_66, %c0_67] : memref<7x32x32xbf16, #tpu.memory_space<vmem>>, vector<1x32x32xbf16>
    %87 = vector.shape_cast %86 : vector<1x32x32xbf16> to vector<32x32xbf16>
    %cst_68 = arith.constant dense<0.000000e+00> : vector<32x32xf32>
    %88 = tpu.matmul %85, %87, %cst_68 {dimension_numbers = #tpu.dot_dimension_numbers<[1], [0], [0], [1], [0, 0, 1, 1], [], []>} : vector<32x32xbf16>, vector<32x32xbf16>, vector<32x32xf32> -> vector<32x32xf32>
    %89 = arith.addf %82, %88 : vector<32x32xf32>
    %c4_69 = arith.constant 4 : index
    %c0_70 = arith.constant 0 : index
    %90 = vector.load %arg3[%c4_69, %c0_70] : memref<6x32xf32, #tpu.memory_space<vmem>>, vector<1x32xf32>
    %c5_71 = arith.constant 5 : index
    %c0_72 = arith.constant 0 : index
    %91 = vector.load %arg3[%c5_71, %c0_72] : memref<6x32xf32, #tpu.memory_space<vmem>>, vector<1x32xf32>
    %92 = vector.broadcast %90 : vector<1x32xf32> to vector<32x32xf32>
    %93 = arith.mulf %89, %92 : vector<32x32xf32>
    %94 = vector.broadcast %91 : vector<1x32xf32> to vector<32x32xf32>
    %95 = arith.addf %93, %94 : vector<32x32xf32>
    %96 = arith.mulf %95, %95 : vector<32x32xf32>
    %97 = arith.mulf %95, %96 : vector<32x32xf32>
    %cst_73 = arith.constant 4.471500e-02 : f32
    %98 = vector.broadcast %cst_73 : f32 to vector<32x32xf32>
    %99 = arith.mulf %98, %97 : vector<32x32xf32>
    %100 = arith.addf %95, %99 : vector<32x32xf32>
    %cst_74 = arith.constant 0.797884583 : f32
    %101 = vector.broadcast %cst_74 : f32 to vector<32x32xf32>
    %102 = arith.mulf %101, %100 : vector<32x32xf32>
    %103 = math.tanh %102 : vector<32x32xf32>
    %cst_75 = arith.constant 1.000000e+00 : f32
    %104 = vector.broadcast %cst_75 : f32 to vector<32x32xf32>
    %105 = arith.addf %104, %103 : vector<32x32xf32>
    %cst_76 = arith.constant 5.000000e-01 : f32
    %106 = vector.broadcast %cst_76 : f32 to vector<32x32xf32>
    %107 = arith.mulf %106, %105 : vector<32x32xf32>
    %108 = arith.mulf %95, %107 : vector<32x32xf32>
    %109 = vector.shape_cast %108 : vector<32x32xf32> to vector<2x16x32xf32>
    %c0_77 = arith.constant 0 : index
    %c0_78 = arith.constant 0 : index
    %c0_79 = arith.constant 0 : index
    %110 = vector.load %arg4[%c0_77, %c0_78, %c0_79] : memref<2x16x32xf32, #tpu.memory_space<vmem>>, vector<2x16x32xf32>
    tpu.vector_store %arg4[%c0_77, %c0_78, %c0_79], %109 {strides = array<i32>} : memref<2x16x32xf32, #tpu.memory_space<vmem>>, vector<2x16x32xf32>,
    return
  }
  func.func @transform_0(%arg0: i32) -> (i32, i32, i32) {
    %c0_i32 = arith.constant 0 : i32
    %c0_i32_0 = arith.constant 0 : i32
    %c0_i32_1 = arith.constant 0 : i32
    return %arg0, %c0_i32, %c0_i32_0 : i32, i32, i32
  }
  func.func @transform_1(%arg0: i32) -> (i32, i32, i32) {
    %c0_i32 = arith.constant 0 : i32
    %c0_i32_0 = arith.constant 0 : i32
    %c0_i32_1 = arith.constant 0 : i32
    %c0_i32_2 = arith.constant 0 : i32
    return %c0_i32, %c0_i32_0, %c0_i32_1 : i32, i32, i32
  }
  func.func @transform_2(%arg0: i32) -> (i32, i32) {
    %c0_i32 = arith.constant 0 : i32
    %c0_i32_0 = arith.constant 0 : i32
    %c0_i32_1 = arith.constant 0 : i32
    return %c0_i32, %c0_i32_0 : i32, i32
  }
  func.func @transform_3(%arg0: i32) -> (i32, i32, i32) {
    %c0_i32 = arith.constant 0 : i32
    %c0_i32_0 = arith.constant 0 : i32
    %c0_i32_1 = arith.constant 0 : i32
    return %arg0, %c0_i32, %c0_i32_0 : i32, i32, i32
  }
}

</mosaic_0001>

<bundles_post_ra>
// kernel: enhance_forward.1
= control target key start
LH: loop header
LB: loop body
LE: loop exit
PB: predicated region body
PF: predicated region fallthrough
CT: control target
= control target key end

     0   :  { %8 = vsyncpa [#allocation4], 0  ;;  %s832_s0 = inlined_call_operand.vmem [shape: bf16[2,16,32], index: 0, kind: input, shape index: {}]   ;;  %s833_s1 = inlined_call_operand.hbm [shape: bf16[7,32,32], index: 1, kind: input, shape index: {}]   ;;  %s834_s2 = inlined_call_operand.vmem [shape: f32[6,32], index: 2, kind: input, shape index: {}]   ;;  %s835_s3 = inlined_call_operand.hbm [shape: f32[2,16,32], index: 3, kind: output, shape index: {}]  }
   0x1   :  { %9 = vsyncpa [#allocation5], 0  ;;  %s16_s14 = sshll.u32 %s833_s1, 4  ;;  %s749_s15 = smov [#allocation3]   ;;  %s17_s14 = int_to_ptr.hbm [resolvable:$true] %s16_s14 }
   0x2   :  { %s18_s16 = sshll.u32 %s749_s15, 4  ;;  %s750_s17 = smov 64   ;;  %s19_s16 = int_to_ptr.vmem [resolvable:$true] %s18_s16 }
   0x3   :  { %s751_s18 = smov 4  }
   0x4   :  { %24 = dma.hbm_to_vmem [thread:$0]  %s17_s14, 1792, %s19_s16, [#allocation4], %s750_s17, %s750_s17, %s751_s18  }
   0x5   :  { %745 = dma.done.wait [#allocation4], 1792  }
   0x6   :  { %746 = vsyncadd [#allocation4], 4294965504  ;;  %v645_v0 = vld [vmem:[#allocation3 + $0x8] sm:$0xff]  ;;  %v644_v1 = vld [vmem:[#allocation3] sm:$0xff]  ;;  %vm62_vm0 = vcmask 261120   ;;  %vm136_vm1 = vcmask 256000  }
   0x7   :  { %75 = vmatpush.bf16.msra.mxu0 %v645_v0  ;;  %658 = vmatpush.bf16.msra.mxu3 %v645_v0  ;;  %v642_v2 = vld [vmem:[%s832_s0] sm:$0xff]  ;;  %v643_v3 = vld [vmem:[%s832_s0 + $0x8] sm:$0xff]  ;;  %v752_v4 = vmov 0.0   ;;  %v649_v12 = vld [vmem:[#allocation3 + $0x28] sm:$0xff]  ;;  %s551_s9 = sshll.u32 %s835_s3, 4  ;;  %s754_s10 = smov 128   ;;  %s552_s9 = int_to_ptr.hbm [resolvable:$true] %s551_s9 }
   0x8   :  { %137 = vst.msk [vmem:[#allocation2] sm:$0x7] %vm136_vm1, %v752_v4  ;;  %v667_v5 = vld [vmem:[%s834_s2] ss:$0 sm:$0xff]  ;;  %v668_v6 = vld [vmem:[%s834_s2 + $0x1] ss:$0 sm:$0xff]  ;;  %191 = vmatpush.bf16.msra.mxu1 %v649_v12 }
   0x9   :  { %138 = vst.msk [vmem:[#allocation2 + $0x18] sm:$0x7] %vm136_vm1, %v752_v4  ;;  %v651_v11 = vld [vmem:[#allocation3 + $0x38] sm:$0xff]  ;;  %v650_v21 = vld [vmem:[#allocation3 + $0x30] sm:$0xff]  ;;  %v648_v22 = vld [vmem:[#allocation3 + $0x20] sm:$0xff]  ;;  %s755_s11 = smov 8  }
   0xa   :  { %139 = vst.msk [vmem:[#allocation2 + $0x13] sm:$0x7] %vm136_vm1, %v752_v4  ;;  %v647_v13 = vld [vmem:[#allocation3 + $0x18] sm:$0xff]  ;;  %v646_v23 = vld [vmem:[#allocation3 + $0x10] sm:$0xff] }
   0xb   :  { %76 = vmatpush.bf16.msra.mxu0 %v644_v1  ;;  %659 = vmatpush.bf16.msra.mxu3 %v644_v1  ;;  %140 = vst.msk [vmem:[#allocation2 + $0x2b] sm:$0x7] %vm136_vm1, %v752_v4 }
   0xc   :  { %228 = vmatpush.bf16.msra.mxu2 %v647_v13  ;;  %192 = vmatpush.bf16.msra.mxu1 %v648_v22 }
   0xe   :  { %580 = vmatmul.msk.bf16.vlgmr.msra.gmra.mxu0 %vm62_vm0, %v642_v2  ;;  %581 = vmatmul.msk.bf16.vlgmr.msra.gmra.mxu3 %vm62_vm0, %v643_v3 }
   0xf   :  { %276 = vmatpush.bf16.msrb.mxu3 %v651_v11 }
  0x10   :  { %229 = vmatpush.bf16.msra.mxu2 %v646_v23 }
  0x13   :  { %277 = vmatpush.bf16.msrb.mxu3 %v650_v21  ;;  %v670_v21 = vld [vmem:[%s834_s2 + $0x3] ss:$0 sm:$0xff] }
  0x8b   :  { %v78_v7 = vpop.f32.mrf.mxu0 }
  0x8c   :  { %v91_v8 = vmul.f32 %v667_v5, %v78_v7 }
  0x8e   :  { %v96_v9 = vadd.f32 %v668_v6, %v91_v8 }
  0x90   :  { %v100_v10 = vmul.f32 %v96_v9, %v96_v9 }
  0x91   :  { %v83_v14 = vpop.f32.mrf.mxu3 }
  0x92   :  { %v104_v15 = vmul.f32 %v100_v10, %v96_v9  ;;  %v93_v16 = vmul.f32 %v667_v5, %v83_v14 }
  0x93   :  { %v80_v17 = vpop.f32.mrf.mxu0 }
  0x94   :  { %v108_v18 = vmul.f32 0.044715, %v104_v15  ;;  %v98_v19 = vadd.f32 %v668_v6, %v93_v16  ;;  %v92_v20 = vmul.f32 %v667_v5, %v80_v17 }
  0x96   :  { %v112_v24 = vadd.f32 %v108_v18, %v96_v9  ;;  %v102_v25 = vmul.f32 %v98_v19, %v98_v19  ;;  %v97_v26 = vadd.f32 %v668_v6, %v92_v20 }
  0x98   :  { %v116_v27 = vmul.f32 0.7978846, %v112_v24  ;;  %v106_v28 = vmul.f32 %v102_v25, %v98_v19  ;;  %v101_v29 = vmul.f32 %v97_v26, %v97_v26 }
  0x99   :  { %v85_v30 = vpop.f32.mrf.mxu3 }
  0x9a   :  { %673 = vtanh.f32 %v116_v27  ;;  %v110_v31 = vmul.f32 0.044715, %v106_v28  ;;  %v105_v32 = vmul.f32 %v101_v29, %v97_v26  ;;  %v94_v33 = vmul.f32 %v667_v5, %v85_v30  ;;  %v657_v29 = vld [vmem:[#allocation3 + $0x68] sm:$0xff] }
  0x9b   :  { %v653_v30 = vld [vmem:[#allocation3 + $0x48] sm:$0xff]  ;;  %476 = vmatpush.bf16.msrb.mxu2 %v657_v29 }
  0x9c   :  { %v114_v34 = vadd.f32 %v110_v31, %v98_v19  ;;  %v109_v35 = vmul.f32 0.044715, %v105_v32  ;;  %v99_v36 = vadd.f32 %v668_v6, %v94_v33  ;;  %v655_v31 = vld [vmem:[#allocation3 + $0x58] sm:$0xff]  ;;  %428 = vmatpush.bf16.msrb.mxu1 %v653_v30 }
  0x9d   :  { %391 = vmatpush.bf16.msrb.mxu0 %v655_v31 }
  0x9e   :  { %v118_v37 = vmul.f32 0.7978846, %v114_v34  ;;  %v113_v38 = vadd.f32 %v109_v35, %v97_v26  ;;  %v103_v39 = vmul.f32 %v99_v36, %v99_v36 }
  0xa0   :  { %v674_v40 = vpop.eup %673  ;;  %675 = vtanh.f32 %v118_v37  ;;  %v117_v41 = vmul.f32 0.7978846, %v113_v38  ;;  %v107_v42 = vmul.f32 %v103_v39, %v99_v36  ;;  %v656_v37 = vld [vmem:[#allocation3 + $0x60] sm:$0xff]  ;;  %v654_v39 = vld [vmem:[#allocation3 + $0x50] sm:$0xff] }
  0xa1   :  { %v124_v43 = vadd.f32 1.0, %v674_v40  ;;  %v652_v38 = vld [vmem:[#allocation3 + $0x40] sm:$0xff]  ;;  %477 = vmatpush.bf16.msrb.mxu2 %v656_v37  ;;  %392 = vmatpush.bf16.msrb.mxu0 %v654_v39 }
  0xa2   :  { %677 = vtanh.f32 %v117_v41  ;;  %v111_v44 = vmul.f32 0.044715, %v107_v42  ;;  %429 = vmatpush.bf16.msrb.mxu1 %v652_v38 }
  0xa3   :  { %v128_v45 = vmul.f32 0.5, %v124_v43 }
  0xa4   :  { %v115_v46 = vadd.f32 %v111_v44, %v99_v36 }
  0xa5   :  { %v132_v47 = vmul.f32 %v128_v45, %v96_v9 }
  0xa6   :  { %v676_v48 = vpop.eup %675  ;;  %v119_v49 = vmul.f32 0.7978846, %v115_v46 }
  0xa7   :  { %141 = vst.msk [vmem:[#allocation2 + $0x3] sm:$0xff] %vm62_vm0, %v132_v47  ;;  %v126_v50 = vadd.f32 1.0, %v676_v48 }
  0xa8   :  { %v678_v51 = vpop.eup %677  ;;  %679 = vtanh.f32 %v119_v49 }
  0xa9   :  { %v130_v52 = vmul.f32 0.5, %v126_v50  ;;  %v125_v53 = vadd.f32 1.0, %v678_v51 }
  0xab   :  { %v134_v54 = vmul.f32 %v130_v52, %v98_v19  ;;  %v129_v55 = vmul.f32 0.5, %v125_v53  ;;  %v669_v19 = vld [vmem:[%s834_s2 + $0x2] ss:$0 sm:$0xff] }
  0xad   :  { %143 = vst.msk [vmem:[#allocation2 + $0x1b] sm:$0xff] %vm62_vm0, %v134_v54  ;;  %v133_v56 = vmul.f32 %v129_v55, %v97_v26 }
  0xae   :  { %v680_v57 = vpop.eup %679  ;;  %v156_v61 = vld [vmem:[#allocation2 + $0x3] sm:$0xff] }
  0xaf   :  { %142 = vst.msk [vmem:[#allocation2 + $0xb] sm:$0xff] %vm62_vm0, %v133_v56  ;;  %v127_v58 = vadd.f32 1.0, %v680_v57  ;;  %v145_v62 = vld [vmem:[#allocation2 + $0x2] sm:$0xff] }
  0xb1   :  { %v131_v59 = vmul.f32 0.5, %v127_v58 }
  0xb3   :  { %v135_v60 = vmul.f32 %v131_v59, %v99_v36 }
  0xb4   :  { %v158_v10 = vld [vmem:[#allocation2 + $0x1b] sm:$0xff] }
  0xb5   :  { %144 = vst.msk [vmem:[#allocation2 + $0x23] sm:$0xff] %vm62_vm0, %v135_v60  ;;  %v147_v11 = vld [vmem:[#allocation2 + $0x1a] sm:$0xff] }
  0xb6   :  { %v157_v63 = vld [vmem:[#allocation2 + $0xb] sm:$0xff] }
  0xb7   :  { %v146_v0 = vld [vmem:[#allocation2 + $0xa] sm:$0xff]  ;;  %v160_v2 = vpack.c.bf16 %v157_v63, %v156_v61 }
  0xb8   :  { %v241_v1 = vld [vmem:[#allocation2 + $0x4] sm:$0xff]  ;;  %v149_v3 = vpack.c.bf16 %v146_v0, %v145_v62  ;;  %v242_v4 = vld [vmem:[#allocation2 + $0xc] sm:$0xff] }
  0xb9   :  { %v245_v5 = vpack.c.bf16 %v242_v4, %v241_v1  ;;  %590 = vmatmul.msk.bf16.vlgmr.msra.gmra.mxu1 %vm62_vm0, %v160_v2 }
  0xba   :  { %600 = vmatmul.msk.bf16.vlgmr.msra.gmra.mxu2 %vm62_vm0, %v149_v3 }
  0xbb   :  { %610 = vmatmul.msk.bf16.vlgmr.msrb.gmra.mxu3 %vm62_vm0, %v245_v5 }
  0xbc   :  { %v159_v6 = vld [vmem:[#allocation2 + $0x23] sm:$0xff] }
  0xbd   :  { %v148_v7 = vld [vmem:[#allocation2 + $0x22] sm:$0xff]  ;;  %v161_v12 = vpack.c.bf16 %v159_v6, %v158_v10 }
  0xbe   :  { %v243_v8 = vld [vmem:[#allocation2 + $0x1c] sm:$0xff]  ;;  %v244_v9 = vld [vmem:[#allocation2 + $0x24] sm:$0xff]  ;;  %v150_v13 = vpack.c.bf16 %v148_v7, %v147_v11 }
  0xbf   :  { %v246_v14 = vpack.c.bf16 %v244_v9, %v243_v8 }
  0xc9   :  { %591 = vmatmul.msk.bf16.gmra.mxu1 %vm62_vm0, %v161_v12 }
  0xca   :  { %601 = vmatmul.msk.bf16.gmra.mxu2 %vm62_vm0, %v150_v13 }
  0xcb   :  { %611 = vmatmul.msk.bf16.gmra.mxu3 %vm62_vm0, %v246_v14 }
 0x136   :  { %v194_v15 = vpop.f32.mrf.mxu1 }
 0x13d   :  { %v231_v16 = vpop.f32.mrf.mxu2 }
 0x13e   :  { %v232_v17 = vadd.f32 %v231_v16, %v194_v15  ;;  %v279_v18 = vpop.f32.mrf.mxu3  ;;  %v196_v22 = vpop.f32.mrf.mxu1 }
 0x140   :  { %v289_v20 = vadd.f32 %v279_v18, %v232_v17 }
 0x142   :  { %v296_v23 = vmul.f32 %v669_v19, %v289_v20 }
 0x144   :  { %v301_v24 = vadd.f32 %v670_v21, %v296_v23 }
 0x145   :  { %v233_v25 = vpop.f32.mrf.mxu2 }
 0x146   :  { %v305_v26 = vmul.f32 %v301_v24, %v301_v24  ;;  %v234_v27 = vadd.f32 %v233_v25, %v196_v22  ;;  %v281_v28 = vpop.f32.mrf.mxu3  ;;  %v199_v36 = vpop.f32.mrf.mxu1 }
 0x148   :  { %v309_v32 = vmul.f32 %v305_v26, %v301_v24  ;;  %v290_v33 = vadd.f32 %v281_v28, %v234_v27 }
 0x14a   :  { %v313_v34 = vmul.f32 0.044715, %v309_v32  ;;  %v297_v35 = vmul.f32 %v669_v19, %v290_v33 }
 0x14c   :  { %v317_v40 = vadd.f32 %v313_v34, %v301_v24  ;;  %v302_v41 = vadd.f32 %v670_v21, %v297_v35 }
 0x14d   :  { %v236_v42 = vpop.f32.mrf.mxu2 }
 0x14e   :  { %v321_v43 = vmul.f32 0.7978846, %v317_v40  ;;  %v306_v44 = vmul.f32 %v302_v41, %v302_v41  ;;  %v237_v45 = vadd.f32 %v236_v42, %v199_v36  ;;  %v284_v46 = vpop.f32.mrf.mxu3  ;;  %v201_v53 = vpop.f32.mrf.mxu1 }
 0x150   :  { %681 = vtanh.f32 %v321_v43  ;;  %v310_v47 = vmul.f32 %v306_v44, %v302_v41  ;;  %v291_v48 = vadd.f32 %v284_v46, %v237_v45  ;;  %v671_v44 = vld [vmem:[%s834_s2 + $0x4] ss:$0 sm:$0xff] }
 0x152   :  { %v314_v49 = vmul.f32 0.044715, %v310_v47  ;;  %v298_v50 = vmul.f32 %v669_v19, %v291_v48  ;;  %v672_v47 = vld [vmem:[%s834_s2 + $0x5] ss:$0 sm:$0xff]  ;;  %s753_s2 = smov [#allocation6]  }
 0x153   :  { %s549_s6 = sshll.u32 %s753_s2, 4  ;;  %s550_s6 = int_to_ptr.vmem [resolvable:$true] %s549_s6 }
 0x154   :  { %v318_v51 = vadd.f32 %v314_v49, %v302_v41  ;;  %v303_v52 = vadd.f32 %v670_v21, %v298_v50 }
 0x155   :  { %v238_v54 = vpop.f32.mrf.mxu2 }
 0x156   :  { %v682_v55 = vpop.eup %681  ;;  %v322_v56 = vmul.f32 0.7978846, %v318_v51  ;;  %v307_v57 = vmul.f32 %v303_v52, %v303_v52  ;;  %v239_v58 = vadd.f32 %v238_v54, %v201_v53  ;;  %v286_v60 = vpop.f32.mrf.mxu3 }
 0x157   :  { %v329_v59 = vadd.f32 1.0, %v682_v55 }
 0x158   :  { %683 = vtanh.f32 %v322_v56  ;;  %v311_v61 = vmul.f32 %v307_v57, %v303_v52  ;;  %v292_v62 = vadd.f32 %v286_v60, %v239_v58 }
 0x159   :  { %v333_v63 = vmul.f32 0.5, %v329_v59 }
 0x15a   :  { %v315_v0 = vmul.f32 0.044715, %v311_v61  ;;  %v299_v1 = vmul.f32 %v669_v19, %v292_v62 }
 0x15b   :  { %v337_v2 = vmul.f32 %v333_v63, %v301_v24 }
 0x15c   :  { %v319_v3 = vadd.f32 %v315_v0, %v303_v52  ;;  %v304_v4 = vadd.f32 %v670_v21, %v299_v1 }
 0x15d   :  { %341 = vst.msk [vmem:[#allocation2 + $0x3] sm:$0xff] %vm62_vm0, %v337_v2 }
 0x15e   :  { %v684_v5 = vpop.eup %683  ;;  %v323_v6 = vmul.f32 0.7978846, %v319_v3  ;;  %v308_v7 = vmul.f32 %v304_v4, %v304_v4 }
 0x15f   :  { %v330_v8 = vadd.f32 1.0, %v684_v5 }
 0x160   :  { %685 = vtanh.f32 %v323_v6  ;;  %v312_v9 = vmul.f32 %v308_v7, %v304_v4 }
 0x161   :  { %v334_v10 = vmul.f32 0.5, %v330_v8 }
 0x162   :  { %v316_v11 = vmul.f32 0.044715, %v312_v9 }
 0x163   :  { %v338_v12 = vmul.f32 %v334_v10, %v302_v41 }
 0x164   :  { %v320_v13 = vadd.f32 %v316_v11, %v304_v4  ;;  %v356_v19 = vld [vmem:[#allocation2 + $0x3] sm:$0xff] }
 0x165   :  { %342 = vst.msk [vmem:[#allocation2 + $0xb] sm:$0xff] %vm62_vm0, %v338_v12  ;;  %v345_v20 = vld [vmem:[#allocation2] sm:$0xff] }
 0x166   :  { %v686_v14 = vpop.eup %685  ;;  %v324_v15 = vmul.f32 0.7978846, %v320_v13 }
 0x167   :  { %v331_v16 = vadd.f32 1.0, %v686_v14 }
 0x168   :  { %687 = vtanh.f32 %v324_v15 }
 0x169   :  { %v335_v17 = vmul.f32 0.5, %v331_v16 }
 0x16b   :  { %v339_v18 = vmul.f32 %v335_v17, %v303_v52 }
 0x16c   :  { %v357_v21 = vld [vmem:[#allocation2 + $0xb] sm:$0xff] }
 0x16d   :  { %v346_v22 = vld [vmem:[#allocation2 + $0x8] sm:$0xff]  ;;  %343 = vst.msk [vmem:[#allocation2 + $0x1b] sm:$0xff] %vm62_vm0, %v339_v18  ;;  %v360_v24 = vpack.c.bf16 %v357_v21, %v356_v19 }
 0x16e   :  { %v441_v23 = vld [vmem:[#allocation2 + $0x6] sm:$0xff]  ;;  %v349_v25 = vpack.c.bf16 %v346_v22, %v345_v20  ;;  %v442_v26 = vld [vmem:[#allocation2 + $0xe] sm:$0xff]  ;;  %v688_v27 = vpop.eup %687 }
 0x16f   :  { %v445_v28 = vpack.c.bf16 %v442_v26, %v441_v23  ;;  %v332_v29 = vadd.f32 1.0, %v688_v27  ;;  %620 = vmatmul.msk.bf16.vlgmr.msrb.gmra.mxu0 %vm62_vm0, %v360_v24 }
 0x170   :  { %630 = vmatmul.msk.bf16.vlgmr.msrb.gmra.mxu1 %vm62_vm0, %v349_v25 }
 0x171   :  { %640 = vmatmul.msk.bf16.vlgmr.msrb.gmra.mxu2 %vm62_vm0, %v445_v28  ;;  %v336_v30 = vmul.f32 0.5, %v332_v29 }
 0x173   :  { %v340_v31 = vmul.f32 %v336_v30, %v304_v4 }
 0x174   :  { %v358_v32 = vld [vmem:[#allocation2 + $0x1b] sm:$0xff] }
 0x175   :  { %344 = vst.msk [vmem:[#allocation2 + $0x23] sm:$0xff] %vm62_vm0, %v340_v31  ;;  %v347_v33 = vld [vmem:[#allocation2 + $0x18] sm:$0xff] }
 0x17c   :  { %v359_v34 = vld [vmem:[#allocation2 + $0x23] sm:$0xff] }
 0x17d   :  { %v348_v35 = vld [vmem:[#allocation2 + $0x20] sm:$0xff]  ;;  %v361_v37 = vpack.c.bf16 %v359_v34, %v358_v32 }
 0x17e   :  { %v443_v36 = vld [vmem:[#allocation2 + $0x1e] sm:$0xff]  ;;  %v350_v38 = vpack.c.bf16 %v348_v35, %v347_v33  ;;  %v444_v39 = vld [vmem:[#allocation2 + $0x26] sm:$0xff] }
 0x17f   :  { %v446_v40 = vpack.c.bf16 %v444_v39, %v443_v36  ;;  %621 = vmatmul.msk.bf16.gmra.mxu0 %vm62_vm0, %v361_v37 }
 0x180   :  { %631 = vmatmul.msk.bf16.gmra.mxu1 %vm62_vm0, %v350_v38 }
 0x181   :  { %641 = vmatmul.msk.bf16.gmra.mxu2 %vm62_vm0, %v446_v40 }
 0x1ec   :  { %v394_v41 = vpop.f32.mrf.mxu0 }
 0x1ed   :  { %v431_v42 = vpop.f32.mrf.mxu1 }
 0x1ee   :  { %v432_v43 = vadd.f32 %v431_v42, %v394_v41 }
 0x1f4   :  { %v479_v45 = vpop.f32.mrf.mxu2  ;;  %v396_v48 = vpop.f32.mrf.mxu0 }
 0x1f5   :  { %v489_v46 = vadd.f32 %v479_v45, %v432_v43  ;;  %v433_v49 = vpop.f32.mrf.mxu1 }
 0x1f6   :  { %v434_v53 = vadd.f32 %v433_v49, %v396_v48 }
 0x1f7   :  { %v496_v50 = vmul.f32 %v671_v44, %v489_v46 }
 0x1f9   :  { %v501_v51 = vadd.f32 %v672_v47, %v496_v50 }
 0x1fb   :  { %v505_v52 = vmul.f32 %v501_v51, %v501_v51 }
 0x1fc   :  { %v481_v54 = vpop.f32.mrf.mxu2  ;;  %v399_v57 = vpop.f32.mrf.mxu0 }
 0x1fd   :  { %v509_v55 = vmul.f32 %v505_v52, %v501_v51  ;;  %v490_v56 = vadd.f32 %v481_v54, %v434_v53  ;;  %v436_v58 = vpop.f32.mrf.mxu1 }
 0x1fe   :  { %v437_v1 = vadd.f32 %v436_v58, %v399_v57 }
 0x1ff   :  { %v513_v59 = vmul.f32 0.044715, %v509_v55  ;;  %v497_v60 = vmul.f32 %v671_v44, %v490_v56 }
 0x201   :  { %v517_v61 = vadd.f32 %v513_v59, %v501_v51  ;;  %v502_v62 = vadd.f32 %v672_v47, %v497_v60 }
 0x203   :  { %v521_v63 = vmul.f32 0.7978846, %v517_v61  ;;  %v506_v0 = vmul.f32 %v502_v62, %v502_v62 }
 0x204   :  { %v484_v2 = vpop.f32.mrf.mxu2  ;;  %v401_v7 = vpop.f32.mrf.mxu0 }
 0x205   :  { %689 = vtanh.f32 %v521_v63  ;;  %v510_v3 = vmul.f32 %v506_v0, %v502_v62  ;;  %v491_v4 = vadd.f32 %v484_v2, %v437_v1  ;;  %v438_v8 = vpop.f32.mrf.mxu1 }
 0x206   :  { %v439_v14 = vadd.f32 %v438_v8, %v401_v7 }
 0x207   :  { %v514_v5 = vmul.f32 0.044715, %v510_v3  ;;  %v498_v6 = vmul.f32 %v671_v44, %v491_v4 }
 0x209   :  { %v518_v9 = vadd.f32 %v514_v5, %v502_v62  ;;  %v503_v10 = vadd.f32 %v672_v47, %v498_v6 }
 0x20b   :  { %v690_v11 = vpop.eup %689  ;;  %v522_v12 = vmul.f32 0.7978846, %v518_v9  ;;  %v507_v13 = vmul.f32 %v503_v10, %v503_v10 }
 0x20c   :  { %v529_v15 = vadd.f32 1.0, %v690_v11  ;;  %v486_v16 = vpop.f32.mrf.mxu2 }
 0x20d   :  { %691 = vtanh.f32 %v522_v12  ;;  %v511_v17 = vmul.f32 %v507_v13, %v503_v10  ;;  %v492_v18 = vadd.f32 %v486_v16, %v439_v14 }
 0x20e   :  { %v533_v19 = vmul.f32 0.5, %v529_v15 }
 0x20f   :  { %v515_v20 = vmul.f32 0.044715, %v511_v17  ;;  %v499_v21 = vmul.f32 %v671_v44, %v492_v18 }
 0x210   :  { %v537_v22 = vmul.f32 %v533_v19, %v501_v51 }
 0x211   :  { %v519_v23 = vadd.f32 %v515_v20, %v503_v10  ;;  %v504_v24 = vadd.f32 %v672_v47, %v499_v21 }
 0x212   :  { %541 = vst.msk [vmem:[#allocation6] sm:$0xff] %vm62_vm0, %v537_v22 }
 0x213   :  { %v692_v25 = vpop.eup %691  ;;  %v523_v26 = vmul.f32 0.7978846, %v519_v23  ;;  %v508_v27 = vmul.f32 %v504_v24, %v504_v24 }
 0x214   :  { %v530_v28 = vadd.f32 1.0, %v692_v25 }
 0x215   :  { %693 = vtanh.f32 %v523_v26  ;;  %v512_v29 = vmul.f32 %v508_v27, %v504_v24 }
 0x216   :  { %v534_v30 = vmul.f32 0.5, %v530_v28 }
 0x217   :  { %v516_v31 = vmul.f32 0.044715, %v512_v29 }
 0x218   :  { %v538_v32 = vmul.f32 %v534_v30, %v502_v62 }
 0x219   :  { %v520_v33 = vadd.f32 %v516_v31, %v504_v24 }
 0x21a   :  { %542 = vst.msk [vmem:[#allocation6 + $0x8] sm:$0xff] %vm62_vm0, %v538_v32 }
 0x21b   :  { %v694_v34 = vpop.eup %693  ;;  %v524_v35 = vmul.f32 0.7978846, %v520_v33 }
 0x21c   :  { %v531_v36 = vadd.f32 1.0, %v694_v34 }
 0x21d   :  { %695 = vtanh.f32 %v524_v35 }
 0x21e   :  { %v535_v37 = vmul.f32 0.5, %v531_v36 }
 0x220   :  { %v539_v38 = vmul.f32 %v535_v37, %v503_v10 }
 0x222   :  { %543 = vst.msk [vmem:[#allocation6 + $0x10] sm:$0xff] %vm62_vm0, %v539_v38 }
 0x223   :  { %v696_v39 = vpop.eup %695 }
 0x224   :  { %v532_v40 = vadd.f32 1.0, %v696_v39 }
 0x226   :  { %v536_v41 = vmul.f32 0.5, %v532_v40 }
 0x228   :  { %v540_v42 = vmul.f32 %v536_v41, %v504_v24 }
 0x22a   :  { %544 = vst.msk [vmem:[#allocation6 + $0x18] sm:$0xff] %vm62_vm0, %v540_v42 }
 0x22b   :  { %557 = dma.vmem_to_hbm [thread:$0]  %s550_s6, 512, %s552_s9, [#allocation5], %s754_s10, %s754_s10, %s755_s11  }
 0x22c   :  { %747 = dma.done.wait [#allocation5], 512  }
 0x22d   :  { %748 = vsyncadd [#allocation5], 4294966784 }
 0x22e   :  { %562 = vsyncpa [#allocation4], 1 }
 0x22f   :  { %563 = vsyncpa [#allocation5], 1 }

</bundles_post_ra>
